<compile_context>
chip_gen: v7x
topology: tpu7x:2x2x1
jax: 0.10.0
libtpu: 0.0.40
codegen_flags: <defaults>
</compile_context>

<pallas_src>
import jax
import jax.numpy as jnp
from jax.experimental import pallas as pl
from jax.experimental.pallas import tpu as pltpu

C_IN = 3
C_OUT = 3
KH = 3
KW = 3


def _make_conv_kernel(n, h, w):
    """Build the kernel for fixed (N, H, W); all loop bounds are static."""
    hw = h * w
    n_taps = KH * KW

    def kernel(x_ref, w_ref, b_ref, o_ref):
        # x_ref : VMEM (N*C_IN, H*W)   -- free reshape of NCHW
        # w_ref : VMEM (C_OUT, KH*KW*C_IN), columns ordered (tap, ci)
        # b_ref : VMEM (C_OUT, 1)
        # o_ref : VMEM (N*C_OUT, H*W)
        x = x_ref[...]          # (N*C_IN, HW) f32
        wmat = w_ref[...]       # (C_OUT, 27)
        bias = b_ref[...]       # (C_OUT, 1)

        # 9 lane-rolls of the full block (XLU slot); reused by every batch/co.
        rolled = []
        for kh in range(KH):
            for kw in range(KW):
                s = kh * w + kw
                rolled.append(x if s == 0 else pltpu.roll(x, shift=hw - s, axis=1))

        # One MXU matmul per batch image: (C_OUT, 27) x (27, HW) -> (C_OUT, HW).
        for b in range(n):
            slab = jnp.concatenate(
                [r[b * C_IN:(b + 1) * C_IN, :] for r in rolled], axis=0)  # (27, HW)
            out_b = jnp.dot(wmat, slab,
                            preferred_element_type=jnp.float32) + bias
            o_ref[b * C_OUT:(b + 1) * C_OUT, :] = out_b

    return kernel


@jax.jit
def conv3x3_valid(x, weight, bias):
    """x: (N, 3, H, W) f32; weight: (3, 3, 3, 3) OIHW; bias: (3,).

    Returns (N, 3, H-2, W-2), matching nn.Conv2d(3, 3, 3) (stride 1, no pad).
    """
    n, cin, h, w = x.shape
    assert cin == C_IN
    ho, wo = h - (KH - 1), w - (KW - 1)
    hw = h * w

    # Copy-free layout: rows = (n, ci), lanes = flattened (h, w).
    x2 = x.astype(jnp.float32).reshape(n * C_IN, hw)
    # Weight columns ordered (tap, ci) to match the slab row order (81 floats).
    w2 = weight.astype(jnp.float32).transpose(0, 2, 3, 1).reshape(
        C_OUT, KH * KW * C_IN)
    b2 = bias.astype(jnp.float32).reshape(C_OUT, 1)

    out2 = pl.pallas_call(
        _make_conv_kernel(n, h, w),
        out_shape=jax.ShapeDtypeStruct((n * C_OUT, hw), jnp.float32),
        in_specs=[
            pl.BlockSpec(memory_space=pltpu.MemorySpace.VMEM),   # image
            pl.BlockSpec(memory_space=pltpu.MemorySpace.VMEM),   # weights
            pl.BlockSpec(memory_space=pltpu.MemorySpace.VMEM),   # bias
        ],
        out_specs=pl.BlockSpec(memory_space=pltpu.MemorySpace.VMEM),
    )(x2, w2, b2)

    # Undo the layout (reshape only) and crop to the VALID output window.
    out = out2.reshape(n, C_OUT, h, w)
    return out[:, :, :ho, :wo]


class ExampleBackbone:
    """JAX/Pallas port of the PyTorch ExampleBackbone (Conv2d(3, 3, 3))."""

    def __init__(self, out_indices=None, key=None):
        if key is None:
            key = jax.random.PRNGKey(0)
        kw_, kb_ = jax.random.split(key)
        # Deterministic init mimicking nn.Conv2d defaults (uniform +-1/sqrt(fan_in)).
        fan_in = C_IN * KH * KW
        bound = 1.0 / (fan_in ** 0.5)
        self.weight = jax.random.uniform(
            kw_, (C_OUT, C_IN, KH, KW), jnp.float32, -bound, bound)
        self.bias = jax.random.uniform(kb_, (C_OUT,), jnp.float32, -bound, bound)
        self.out_indices = out_indices

    def init_weights(self, pretrained=None):
        pass

    def __call__(self, x):
        # Compute the conv once; every requested index gets the same feature map.
        out = conv3x3_valid(x, self.weight, self.bias)
        if self.out_indices is None:
            return [out]
        return [out for _ in self.out_indices]


def _reference_conv(x, w, b):
    out = jax.lax.conv_general_dilated(
        x, w, window_strides=(1, 1), padding="VALID",
        dimension_numbers=("NCHW", "OIHW", "NCHW"))
    return out + b.reshape(1, C_OUT, 1, 1)


if __name__ == "__main__":
    key = jax.random.PRNGKey(0)
    kx, kp = jax.random.split(key)
    # Small NCHW input: batch=2, channels=3 (required by Conv2d(3,3,3)), 16x16 spatial.
    x = jax.random.normal(kx, (2, 3, 16, 16), dtype=jnp.float32)

    backbone = ExampleBackbone(out_indices=None, key=kp)
    outs = backbone(x)
    out = jax.block_until_ready(outs[0])
    assert out.shape == (2, 3, 14, 14), out.shape

    ref = jax.block_until_ready(_reference_conv(x, backbone.weight, backbone.bias))
    assert jnp.allclose(out, ref, atol=1e-5, rtol=1e-5), \
        float(jnp.max(jnp.abs(out - ref)))

    # Also exercise the out_indices branch (list of identical conv outputs,
    # computed once and reused).
    backbone2 = ExampleBackbone(out_indices=(0, 1), key=kp)
    outs2 = backbone2(x)
    jax.block_until_ready(outs2[-1])
    assert len(outs2) == 2
    assert jnp.allclose(outs2[0], ref, atol=1e-5, rtol=1e-5)

    print("KERNEL_OK")
</pallas_src>

<mosaic_0001>
module attributes {stable_mosaic.version = 11 : i64} {
  func.func @kernel(%arg0: memref<6x256xf32, #tpu.memory_space<vmem>>, %arg1: memref<3x27xf32, #tpu.memory_space<vmem>>, %arg2: memref<3x1xf32, #tpu.memory_space<vmem>>, %arg3: memref<6x256xf32, #tpu.memory_space<vmem>>) attributes {dimension_semantics = [], scalar_prefetch = 0 : i64, scratch_operands = 0 : i64, tpu.core_type = #tpu.core_type<tc>} {
    %c0 = arith.constant 0 : index
    %c0_0 = arith.constant 0 : index
    %0 = vector.load %arg0[%c0, %c0_0] : memref<6x256xf32, #tpu.memory_space<vmem>>, vector<6x256xf32>
    %c0_1 = arith.constant 0 : index
    %c0_2 = arith.constant 0 : index
    %1 = vector.load %arg1[%c0_1, %c0_2] : memref<3x27xf32, #tpu.memory_space<vmem>>, vector<3x27xf32>
    %c0_3 = arith.constant 0 : index
    %c0_4 = arith.constant 0 : index
    %2 = vector.load %arg2[%c0_3, %c0_4] : memref<3x1xf32, #tpu.memory_space<vmem>>, vector<3x1xf32>
    %c255_i32 = arith.constant 255 : i32
    %3 = tpu.dynamic_rotate %0 by %c255_i32 dim 1 : vector<6x256xf32>, i32 -> vector<6x256xf32>
    %c254_i32 = arith.constant 254 : i32
    %4 = tpu.dynamic_rotate %0 by %c254_i32 dim 1 : vector<6x256xf32>, i32 -> vector<6x256xf32>
    %c240_i32 = arith.constant 240 : i32
    %5 = tpu.dynamic_rotate %0 by %c240_i32 dim 1 : vector<6x256xf32>, i32 -> vector<6x256xf32>
    %c239_i32 = arith.constant 239 : i32
    %6 = tpu.dynamic_rotate %0 by %c239_i32 dim 1 : vector<6x256xf32>, i32 -> vector<6x256xf32>
    %c238_i32 = arith.constant 238 : i32
    %7 = tpu.dynamic_rotate %0 by %c238_i32 dim 1 : vector<6x256xf32>, i32 -> vector<6x256xf32>
    %c224_i32 = arith.constant 224 : i32
    %8 = tpu.dynamic_rotate %0 by %c224_i32 dim 1 : vector<6x256xf32>, i32 -> vector<6x256xf32>
    %c223_i32 = arith.constant 223 : i32
    %9 = tpu.dynamic_rotate %0 by %c223_i32 dim 1 : vector<6x256xf32>, i32 -> vector<6x256xf32>
    %c222_i32 = arith.constant 222 : i32
    %10 = tpu.dynamic_rotate %0 by %c222_i32 dim 1 : vector<6x256xf32>, i32 -> vector<6x256xf32>
    %11 = vector.extract_strided_slice %0 {offsets = [0, 0], sizes = [3, 256], strides = [1, 1]} : vector<6x256xf32> to vector<3x256xf32>
    %12 = vector.extract_strided_slice %3 {offsets = [0, 0], sizes = [3, 256], strides = [1, 1]} : vector<6x256xf32> to vector<3x256xf32>
    %13 = vector.extract_strided_slice %4 {offsets = [0, 0], sizes = [3, 256], strides = [1, 1]} : vector<6x256xf32> to vector<3x256xf32>
    %14 = vector.extract_strided_slice %5 {offsets = [0, 0], sizes = [3, 256], strides = [1, 1]} : vector<6x256xf32> to vector<3x256xf32>
    %15 = vector.extract_strided_slice %6 {offsets = [0, 0], sizes = [3, 256], strides = [1, 1]} : vector<6x256xf32> to vector<3x256xf32>
    %16 = vector.extract_strided_slice %7 {offsets = [0, 0], sizes = [3, 256], strides = [1, 1]} : vector<6x256xf32> to vector<3x256xf32>
    %17 = vector.extract_strided_slice %8 {offsets = [0, 0], sizes = [3, 256], strides = [1, 1]} : vector<6x256xf32> to vector<3x256xf32>
    %18 = vector.extract_strided_slice %9 {offsets = [0, 0], sizes = [3, 256], strides = [1, 1]} : vector<6x256xf32> to vector<3x256xf32>
    %19 = vector.extract_strided_slice %10 {offsets = [0, 0], sizes = [3, 256], strides = [1, 1]} : vector<6x256xf32> to vector<3x256xf32>
    %20 = tpu.concatenate %11, %12, %13, %14, %15, %16, %17, %18, %19 in 0 : vector<3x256xf32>, vector<3x256xf32>, vector<3x256xf32>, vector<3x256xf32>, vector<3x256xf32>, vector<3x256xf32>, vector<3x256xf32>, vector<3x256xf32>, vector<3x256xf32> -> vector<27x256xf32>
    %cst = arith.constant dense<0.000000e+00> : vector<3x256xf32>
    %21 = tpu.matmul %1, %20, %cst {dimension_numbers = #tpu.dot_dimension_numbers<[1], [0], [0], [1], [0, 0, 1, 1], [], []>} : vector<3x27xf32>, vector<27x256xf32>, vector<3x256xf32> -> vector<3x256xf32>
    %22 = vector.broadcast %2 : vector<3x1xf32> to vector<3x256xf32>
    %23 = arith.addf %21, %22 : vector<3x256xf32>
    %c0_5 = arith.constant 0 : index
    %c0_6 = arith.constant 0 : index
    %24 = vector.load %arg3[%c0_5, %c0_6] : memref<6x256xf32, #tpu.memory_space<vmem>>, vector<3x256xf32>
    tpu.vector_store %arg3[%c0_5, %c0_6], %23 {strides = array<i32>} : memref<6x256xf32, #tpu.memory_space<vmem>>, vector<3x256xf32>,
    %25 = vector.extract_strided_slice %0 {offsets = [3, 0], sizes = [3, 256], strides = [1, 1]} : vector<6x256xf32> to vector<3x256xf32>
    %26 = vector.extract_strided_slice %3 {offsets = [3, 0], sizes = [3, 256], strides = [1, 1]} : vector<6x256xf32> to vector<3x256xf32>
    %27 = vector.extract_strided_slice %4 {offsets = [3, 0], sizes = [3, 256], strides = [1, 1]} : vector<6x256xf32> to vector<3x256xf32>
    %28 = vector.extract_strided_slice %5 {offsets = [3, 0], sizes = [3, 256], strides = [1, 1]} : vector<6x256xf32> to vector<3x256xf32>
    %29 = vector.extract_strided_slice %6 {offsets = [3, 0], sizes = [3, 256], strides = [1, 1]} : vector<6x256xf32> to vector<3x256xf32>
    %30 = vector.extract_strided_slice %7 {offsets = [3, 0], sizes = [3, 256], strides = [1, 1]} : vector<6x256xf32> to vector<3x256xf32>
    %31 = vector.extract_strided_slice %8 {offsets = [3, 0], sizes = [3, 256], strides = [1, 1]} : vector<6x256xf32> to vector<3x256xf32>
    %32 = vector.extract_strided_slice %9 {offsets = [3, 0], sizes = [3, 256], strides = [1, 1]} : vector<6x256xf32> to vector<3x256xf32>
    %33 = vector.extract_strided_slice %10 {offsets = [3, 0], sizes = [3, 256], strides = [1, 1]} : vector<6x256xf32> to vector<3x256xf32>
    %34 = tpu.concatenate %25, %26, %27, %28, %29, %30, %31, %32, %33 in 0 : vector<3x256xf32>, vector<3x256xf32>, vector<3x256xf32>, vector<3x256xf32>, vector<3x256xf32>, vector<3x256xf32>, vector<3x256xf32>, vector<3x256xf32>, vector<3x256xf32> -> vector<27x256xf32>
    %cst_7 = arith.constant dense<0.000000e+00> : vector<3x256xf32>
    %35 = tpu.matmul %1, %34, %cst_7 {dimension_numbers = #tpu.dot_dimension_numbers<[1], [0], [0], [1], [0, 0, 1, 1], [], []>} : vector<3x27xf32>, vector<27x256xf32>, vector<3x256xf32> -> vector<3x256xf32>
    %36 = vector.broadcast %2 : vector<3x1xf32> to vector<3x256xf32>
    %37 = arith.addf %35, %36 : vector<3x256xf32>
    %c3 = arith.constant 3 : index
    %c0_8 = arith.constant 0 : index
    %38 = vector.load %arg3[%c3, %c0_8] : memref<6x256xf32, #tpu.memory_space<vmem>>, vector<3x256xf32>
    tpu.vector_store %arg3[%c3, %c0_8], %37 {strides = array<i32>} : memref<6x256xf32, #tpu.memory_space<vmem>>, vector<3x256xf32>,
    return
  }
}

</mosaic_0001>

<bundles_post_ra>
// kernel: conv3x3_valid.1
= control target key start
LH: loop header
LB: loop body
LE: loop exit
PB: predicated region body
PF: predicated region fallthrough
CT: control target
= control target key end

     0   :  { %s438_s16 = smov 111   ;;  %s439_s17 = smov 126   ;;  %v446_v3 = vmov 0.0   ;;  %v447_v4 = vmov 0   ;;  %v22_v6 = vlaneseq  ;;  %vm124_vm2 = vcmask 1040384   ;;  %s630_s0 = inlined_call_operand.vmem [shape: f32[6,256], index: 0, kind: input, shape index: {}]   ;;  %s631_s2 = inlined_call_operand.vmem [shape: f32[3,1], index: 2, kind: input, shape index: {}]   ;;  %s632_s1 = inlined_call_operand.vmem [shape: f32[3,27], index: 1, kind: input, shape index: {}]   ;;  %s633_s3 = inlined_call_operand.vmem [shape: f32[6,256], index: 3, kind: output, shape index: {}]  }
   0x1   :  { %v472_v0 = vld [vmem:[%s630_s0] sm:$0x3f]  ;;  %v477_v1 = vld [vmem:[%s630_s0 + $0x8] sm:$0x3f]  ;;  %s440_s18 = smov 110   ;;  %s441_s19 = smov 112   ;;  %341 = vmatprep.mubr.f32.mxu1 %v446_v3  ;;  %218 = vmatprep.mubr.f32.mxu0 %v446_v3 }
   0x2   :  { %v407_v2 = vpack.i.bf16 %v477_v1, %v472_v0  ;;  %s442_s20 = smov 96   ;;  %s443_s21 = smov 127   ;;  %437 = vset.pattern.permute.xlu0 %v447_v4  ;;  %v17_v5 = vld [vmem:[%s631_s2] sm:$0x7]  ;;  %v484_v7 = vand.u32 127, %v22_v6  ;;  %vm127_vm3 = vcmask 1043456  }
   0x3   :  { %s444_s22 = smov 95   ;;  %s445_s23 = smov 94   ;;  %v230_v14 = vrot.slane %v477_v1, 3  ;;  %vm118_vm9 = vcmask 1042432   ;;  %v229_v22 = vrot.slane %v472_v0, 3  ;;  %vm121_vm11 = vcmask 1045504  }
   0x4   :  { %408 = vrot.lane.b32.xlu1 %v407_v2, %s438_s16  ;;  %398 = vrot.lane.b32.xlu0 %v407_v2, %s439_s17  ;;  %vm45_vm0 = vcmp.lt.s32.totalorder %v484_v7, 111  ;;  %vm31_vm1 = vcmp.lt.s32.totalorder %v484_v7, 126  ;;  %vm52_vm4 = vcmp.lt.s32.totalorder %v484_v7, 110  ;;  %vm38_vm5 = vcmp.lt.s32.totalorder %v484_v7, 112 }
   0x5   :  { %vm59_vm6 = vcmp.lt.s32.totalorder %v484_v7, 96  ;;  %vm24_vm7 = vcmp.lt.s32.totalorder %v484_v7, 127  ;;  %vm66_vm8 = vcmp.lt.s32.totalorder %v484_v7, 95  ;;  %vm73_vm10 = vcmp.lt.s32.totalorder %v484_v7, 94 }
   0x6   :  { %vm130_vm12 = vcmask 1046528   ;;  %vm133_vm13 = vcmask 1041408   ;;  %vm136_vm14 = vcmask 1044480   ;;  %vm448_vm15 = vmmov 1  }
   0x8   :  { %413 = vrot.lane.b32.xlu1 %v407_v2, %s440_s18  ;;  %403 = vrot.lane.b32.xlu0 %v407_v2, %s441_s19 }
   0xc   :  { %423 = vrot.lane.b32.xlu1 %v407_v2, %s442_s20  ;;  %418 = vrot.lane.b32.xlu0 %v407_v2, %s443_s21 }
  0x10   :  { %428 = vrot.lane.b32.xlu0 %v407_v2, %s444_s22  ;;  %433 = vrot.lane.b32.xlu1 %v407_v2, %s445_s23 }
  0x14   :  { %141 = vperm.xlu0 %437, %v17_v5  }
  0x76   :  { %v409_v8 = vpop.permute.xlu1 %408  ;;  %v399_v9 = vpop.permute.xlu0 %398 }
  0x77   :  { %v411_v10 = vunpack.i.h.bf16 %v409_v8  ;;  %v410_v11 = vunpack.i.l.bf16 %v409_v8  ;;  %v401_v12 = vunpack.i.h.bf16 %v399_v9  ;;  %v400_v13 = vunpack.i.l.bf16 %v399_v9 }
  0x79   :  { %v492_v15 = vsel %vm45_vm0, %v410_v11, %v411_v10  ;;  %v494_v16 = vsel %vm45_vm0, %v411_v10, %v410_v11  ;;  %v498_v17 = vsel %vm31_vm1, %v401_v12, %v400_v13  ;;  %v504_v19 = vsel %vm31_vm1, %v400_v13, %v401_v12  ;;  %vm593_vm0 = vmpackc.low %vm118_vm9, %vm448_vm15 }
  0x7a   :  { %v96_v18 = vrot.slane %v492_v15, 4  ;;  %v414_v20 = vpop.permute.xlu1 %413  ;;  %v404_v21 = vpop.permute.xlu0 %403  ;;  %v97_v27 = vrot.slane %v494_v16, 4  ;;  %v241_v28 = vrot.slane %v492_v15, 7  ;;  %v242_v29 = vrot.slane %v494_v16, 7 }
  0x7b   :  { %v416_v23 = vunpack.i.h.bf16 %v414_v20  ;;  %v415_v24 = vunpack.i.l.bf16 %v414_v20  ;;  %v406_v25 = vunpack.i.h.bf16 %v404_v21  ;;  %v405_v26 = vunpack.i.l.bf16 %v404_v21 }
  0x7c   :  { %v234_v30 = vrot.slane %v498_v17, 5  ;;  %v233_v34 = vrot.slane %v504_v19, 5  ;;  %v85_v39 = vrot.slane %v498_v17, 2  ;;  %v84_v40 = vrot.slane %v504_v19, 2 }
  0x7d   :  { %v515_v31 = vsel %vm52_vm4, %v415_v24, %v416_v23  ;;  %v519_v32 = vsel %vm38_vm5, %v405_v26, %v406_v25  ;;  %v523_v33 = vsel %vm38_vm5, %v406_v25, %v405_v26  ;;  %v528_v35 = vsel %vm52_vm4, %v416_v23, %v415_v24 }
  0x7e   :  { %v237_v36 = vrot.slane %v519_v32, 2  ;;  %v424_v37 = vpop.permute.xlu1 %423  ;;  %v419_v38 = vpop.permute.xlu0 %418  ;;  %v238_v41 = vrot.slane %v523_v33, 2  ;;  %v102_v45 = vrot.slane %v515_v31, 1  ;;  %v90_v46 = vrot.slane %v519_v32, 7 }
  0x7f   :  { %v426_v42 = vunpack.i.h.bf16 %v424_v37  ;;  %v425_v43 = vunpack.i.l.bf16 %v424_v37  ;;  %v421_v44 = vunpack.i.h.bf16 %v419_v38  ;;  %v420_v47 = vunpack.i.l.bf16 %v419_v38 }
  0x80   :  { %v263_v48 = vsel %vm124_vm2, %v233_v34, %v237_v36  ;;  %v91_v49 = vrot.slane %v523_v33, 7  ;;  %v246_v52 = vrot.slane %v528_v35, 4  ;;  %v264_v56 = vsel %vm124_vm2, %v234_v30, %v238_v41 }
  0x81   :  { %v540_v50 = vsel %vm59_vm6, %v425_v43, %v426_v42  ;;  %v61_v51 = vsel %vm59_vm6, %v426_v42, %v425_v43  ;;  %v245_v57 = vrot.slane %v515_v31, 4  ;;  %v265_v58 = vsel %vm127_vm3, %v263_v48, %v241_v28  ;;  %v16_v31 = vld [vmem:[%s632_s1] sm:$0x7] }
  0x82   :  { %v108_v53 = vrot.slane %v540_v50, 6  ;;  %v429_v54 = vpop.permute.xlu0 %428  ;;  %v434_v55 = vpop.permute.xlu1 %433  ;;  %v25_v59 = vsel %vm24_vm7, %v420_v47, %v421_v44  ;;  %v109_v63 = vrot.slane %v61_v51, 6  ;;  %v249_v2 = vrot.slane %v540_v50, 1 }
  0x83   :  { %v431_v60 = vunpack.i.h.bf16 %v429_v54  ;;  %v430_v61 = vunpack.i.l.bf16 %v429_v54  ;;  %v436_v62 = vunpack.i.h.bf16 %v434_v55  ;;  %v435_v3 = vunpack.i.l.bf16 %v434_v55 }
  0x84   :  { %v26_v4 = vsel %vm24_vm7, %v421_v44, %v420_v47  ;;  %v250_v5 = vrot.slane %v61_v51, 1  ;;  %v78_v10 = vrot.slane %v25_v59, 5  ;;  %v266_v21 = vsel %vm127_vm3, %v264_v56, %v242_v29 }
  0x85   :  { %v67_v6 = vsel %vm66_vm8, %v430_v61, %v431_v60  ;;  %v68_v8 = vsel %vm66_vm8, %v431_v60, %v430_v61  ;;  %v260_v9 = vsel %vm118_vm9, %v230_v14, %v26_v4  ;;  %v79_v13 = vrot.slane %v26_v4, 5 }
  0x86   :  { %v114_v11 = vrot.slane %v67_v6, 3  ;;  %v115_v12 = vrot.slane %v68_v8, 3  ;;  %v74_v17 = vsel %vm73_vm10, %v435_v3, %v436_v62  ;;  %v75_v19 = vsel %vm73_vm10, %v436_v62, %v435_v3 }
  0x87   :  { %v262_v20 = vsel %vm121_vm11, %v260_v9, %v234_v30  ;;  %v253_v23 = vrot.slane %v67_v6, 6  ;;  %v254_v24 = vrot.slane %v68_v8, 6  ;;  %v257_v25 = vrot.slane %v74_v17, 3 }
  0x88   :  { %v268_v26 = vsel %vm130_vm12, %v266_v21, %v246_v52  ;;  %v258_v14 = vrot.slane %v75_v19, 3  ;;  %v270_v28 = vsel %vm133_vm13, %v246_v52, %v250_v5  ;;  %v259_v33 = vsel %vm118_vm9, %v229_v22, %v25_v59 }
  0x89   :  { %v376_v32 = vpack.c.bf16 %v268_v26, %v262_v20  ;;  %v261_v7 = vsel %vm121_vm11, %v259_v33, %v233_v34  ;;  %v267_v36 = vsel %vm130_vm12, %v265_v58, %v245_v57  ;;  %v103_v30 = vrot.slane %v528_v35, 1 }
  0x8a   :  { %v120_v29 = vsel %vm118_vm9, %v477_v1, %v79_v13  ;;  %v378_v37 = vpack.c.bf16 %v267_v36, %v261_v7  ;;  %v126_v41 = vsel %vm124_vm2, %v85_v39, %v91_v49  ;;  %v119_v42 = vsel %vm118_vm9, %v472_v0, %v78_v10 }
  0x8b   :  { %377 = vmatprep.subr.bf16.mxu1 %v376_v32  ;;  %v123_v38 = vsel %vm121_vm11, %v120_v29, %v85_v39  ;;  %v129_v22 = vsel %vm127_vm3, %v126_v41, %v97_v27  ;;  %v135_v34 = vsel %vm133_vm13, %v103_v30, %v109_v63  ;;  %v122_v35 = vsel %vm121_vm11, %v119_v42, %v84_v40 }
  0x8c   :  { %v125_v43 = vsel %vm124_vm2, %v84_v40, %v90_v46  ;;  %379 = vmatpush1.bf16.msra.mxu1 %v378_v37  ;;  %v132_v1 = vsel %vm130_vm12, %v129_v22, %v103_v30  ;;  %v138_v44 = vsel %vm136_vm14, %v135_v34, %v115_v12  ;;  %v272_v16 = vsel %vm136_vm14, %v270_v28, %v254_v24 }
  0x8d   :  { %v128_v39 = vsel %vm127_vm3, %v125_v43, %v96_v18  ;;  %v366_v27 = vpack.c.bf16 %v132_v1, %v123_v38  ;;  %v370_v46 = vpack.c.bf16 %v75_v19, %v138_v44  ;;  %v380_v47 = vpack.c.bf16 %v258_v14, %v272_v16 }
  0x8e   :  { %v131_v40 = vsel %vm130_vm12, %v128_v39, %v102_v45  ;;  %v134_v15 = vsel %vm133_vm13, %v102_v45, %v108_v53  ;;  %v269_v48 = vsel %vm133_vm13, %v245_v57, %v249_v2  ;;  %vm144_vm1 = vcmask 220160  }
  0x8f   :  { %v368_v18 = vpack.c.bf16 %v131_v40, %v122_v35  ;;  %v137_v49 = vsel %vm136_vm14, %v134_v15, %v114_v11  ;;  %367 = vmatprep.subr.bf16.mxu0 %v366_v27  ;;  %382 = vmatprep.subr.msk.bf16.mxu1 %vm593_vm0, %v380_v47  ;;  %v271_v50 = vsel %vm136_vm14, %v269_v48, %v253_v23 }
  0x90   :  { %v383_v51 = vpack.c.bf16 %v257_v25, %v271_v50  ;;  %v373_v52 = vpack.c.bf16 %v74_v17, %v137_v49 }
  0x91   :  { %369 = vmatpush1.bf16.msra.mxu0 %v368_v18 }
  0x92   :  { %372 = vmatprep.subr.msk.bf16.mxu0 %vm593_vm0, %v370_v46  ;;  %385 = vmatpush1.bf16.msk.msra.mxu1 %vm593_vm0, %v383_v51 }
  0x93   :  { %v142_v45 = vpop.permute.xlu0 %141 }
  0x95   :  { %375 = vmatpush1.bf16.msk.msra.mxu0 %vm593_vm0, %v373_v52  ;;  %365 = vmatmul.mubr.msk.f32.vlgmr.msra.gmra.mrb[0].mxu1 %vm144_vm1, %v16_v31 }
  0x98   :  { %362 = vmatmul.mubr.msk.f32.vlgmr.msra.gmra.mrb[0].mxu0 %vm144_vm1, %v16_v31 }
 0x168   :  { %v343_v53 = vpop.f32.mrb[0].mxu1 }
 0x169   :  { %v344_v54 = vadd.f32 %v343_v53, %v142_v45  ;;  %v345_v55 = vpop.f32.mrb[1].mxu1 }
 0x16a   :  { %v346_v57 = vadd.f32 %v345_v55, %v142_v45 }
 0x16b   :  { %v220_v56 = vpop.f32.mrb[0].mxu0  ;;  %v350_v58 = vrot.slane %v344_v54, 5 }
 0x16c   :  { %v221_v59 = vadd.f32 %v220_v56, %v142_v45  ;;  %v222_v60 = vpop.f32.mrb[1].mxu0  ;;  %v351_v61 = vrot.slane %v346_v57, 5 }
 0x16d   :  { %v223_v62 = vadd.f32 %v222_v60, %v142_v45  ;;  %354 = vst [vmem:[%s633_s3] sm:$0x38] %v350_v58 }
 0x16e   :  { %225 = vst [vmem:[%s633_s3] sm:$0x7] %v221_v59  ;;  %355 = vst [vmem:[%s633_s3 + $0x8] sm:$0x38] %v351_v61 }
 0x16f   :  { %226 = vst [vmem:[%s633_s3 + $0x8] sm:$0x7] %v223_v62 }

</bundles_post_ra>
